<compile_context>
chip_gen: v5e
topology: v5e:2x2
jax: 0.10.0
libtpu: 0.0.40
codegen_flags: <defaults>
</compile_context>

<pallas_src>
import functools

import jax
import jax.numpy as jnp
from jax.experimental import pallas as pl
from jax.experimental.pallas import tpu as pltpu


def _ffn_kernel(x_ref, w1_ref, b1_ref, w2_ref, b2_ref, o_ref, acc_ref):
    # x_ref:  (bm, E)  bf16 token tile
    # w1_ref: (E, bh)  bf16 W1 slab;   b1_ref: (1, bh) f32
    # w2_ref: (bh, E)  bf16 W2 slab;   b2_ref: (1, E)  f32
    # o_ref:  (bm, E)  output tile;    acc_ref: (bm, E) f32 scratch
    h_idx = pl.program_id(1)

    # First matmul + per-slab bias + ReLU (bias/ReLU in f32 on the VPU).
    h = jnp.dot(x_ref[...], w1_ref[...], preferred_element_type=jnp.float32)
    h = jnp.maximum(h + b1_ref[...], 0.0)

    # Second matmul: this hidden slab's partial contribution to the output.
    partial = jnp.dot(h.astype(w2_ref.dtype), w2_ref[...],
                      preferred_element_type=jnp.float32)

    @pl.when(h_idx == 0)
    def _():
        # Direct write on the first reduction step (no zero + RMW).
        acc_ref[...] = partial

    @pl.when(h_idx > 0)
    def _():
        acc_ref[...] += partial

    @pl.when(h_idx == pl.num_programs(1) - 1)
    def _():
        # b2 added exactly once, at finalize.
        # TODO(synk): training-mode nn.Dropout would need pltpu.prng_seed /
        # prng_random_bits masking with 1/(1-p) scaling; eval-mode dropout is
        # the identity.
        o_ref[...] = (acc_ref[...] + b2_ref[...]).astype(o_ref.dtype)


def _round_up(x, m):
    return (x + m - 1) // m * m


def _round_down(x, m):
    return (x // m) * m


def _vmem_capacity_bytes():
    """Generation-aware VMEM capacity; conservative 64 MiB fallback (v7x per-TC)."""
    try:
        return int(pltpu.get_tpu_info().vmem_capacity_bytes)
    except Exception:
        return 64 * 1024 * 1024


def _pick_bh(H, block_h):
    """Largest 128-multiple divisor of H that is <= block_h (full H for tiny/odd H)."""
    if H % 128 != 0:
        return H  # small / non-lane-aligned hidden dims: keep whole H
    for k in range(min(block_h, H) // 128, 0, -1):
        if H % (k * 128) == 0:
            return k * 128
    return H


def _ffn_vmem_bytes(bm, bh, E, out_itemsize):
    """Estimated VMEM footprint (double-buffered inputs/outputs + f32 acc)."""
    return (2 * bm * E * 2               # x tile (bf16), double-buffered
            + 2 * bm * E * out_itemsize  # out tile, double-buffered
            + bm * E * 4                 # f32 accumulator scratch
            + 8 * E * bh                 # W1+W2 slabs (bf16), double-buffered
            + 8 * (bh + E))              # bias slabs (f32), double-buffered


@functools.partial(jax.jit, static_argnames=("block_m", "block_h"))
def feed_forward(x, w1, b1, w2, b2, *, block_m=1024, block_h=512):
    """x: (B, T, E). w1: (E, 4E), b1: (1, 4E), w2: (4E, E), b2: (1, E)."""
    B, T, E = x.shape
    H = w1.shape[1]
    M = B * T
    out_itemsize = x.dtype.itemsize

    vmem_cap = _vmem_capacity_bytes()
    budget = int(vmem_cap * 0.80)        # leave headroom for compiler scratch

    # Hidden slab: lane-aligned divisor of H (streamed reduction axis).
    bh = _pick_bh(H, block_h)

    # Token tile: as large as possible (arithmetic intensity vs streamed
    # weights == bm rows), but (a) no bigger than M, (b) grid[0] >= 2 when M
    # is large so both v7x TensorCores get work, (c) within the VMEM budget.
    if M <= block_m:
        bm = M                                        # single full-extent tile
    else:
        bm = min(block_m, _round_up(pl.cdiv(M, 2), 128))
        per_row = E * (2 * 2 + 2 * out_itemsize + 4)  # x(bf16)x2 + outx2 + acc
        fixed = 8 * E * bh + 8 * (bh + E)             # weight + bias slabs
        bm_cap = max(128, _round_down(max(budget - fixed, 0) // per_row, 128))
        bm = max(128, min(bm, bm_cap))

    grid = (pl.cdiv(M, bm), H // bh)

    # bf16 operands for the MXU; biases and accumulation stay f32.
    x2 = x.reshape(M, E).astype(jnp.bfloat16)
    w1b = w1.astype(jnp.bfloat16)
    w2b = w2.astype(jnp.bfloat16)
    b1f = b1.astype(jnp.float32)
    b2f = b2.astype(jnp.float32)

    usage = _ffn_vmem_bytes(bm, bh, E, out_itemsize)
    vmem_limit = int(min(vmem_cap - (2 << 20),
                         max(usage + (8 << 20), 32 << 20)))

    flops = 4 * M * E * H                             # two matmuls
    bytes_accessed = (M * E * 2                       # x in (bf16)
                      + grid[0] * 2 * E * H * 2       # W1+W2 streamed per tile
                      + (H + E) * 4                   # biases
                      + M * E * out_itemsize)         # out

    out2 = pl.pallas_call(
        _ffn_kernel,
        out_shape=jax.ShapeDtypeStruct((M, E), x.dtype),
        grid_spec=pltpu.PrefetchScalarGridSpec(
            num_scalar_prefetch=0,
            grid=grid,
            in_specs=[
                pl.BlockSpec((bm, E), lambda i, h: (i, 0)),   # x tile
                pl.BlockSpec((E, bh), lambda i, h: (0, h)),   # W1 slab (streamed)
                pl.BlockSpec((1, bh), lambda i, h: (0, h)),   # b1 slab
                pl.BlockSpec((bh, E), lambda i, h: (h, 0)),   # W2 slab (streamed)
                pl.BlockSpec((1, E), lambda i, h: (0, 0)),    # b2
            ],
            out_specs=pl.BlockSpec((bm, E), lambda i, h: (i, 0)),
            scratch_shapes=[pltpu.VMEM((bm, E), jnp.float32)],
        ),
        compiler_params=pltpu.CompilerParams(
            dimension_semantics=("parallel", "arbitrary"),
            vmem_limit_bytes=vmem_limit,
        ),
        cost_estimate=pl.CostEstimate(
            flops=flops, transcendentals=0, bytes_accessed=bytes_accessed),
    )(x2, w1b, b1f, w2b, b2f)

    return out2.reshape(B, T, E)


def init_params(key, num_embed):
    """Deterministic init mimicking nn.Linear defaults (uniform +/- 1/sqrt(fan_in))."""
    hidden = 4 * num_embed
    k1, k2, k3, k4 = jax.random.split(key, 4)
    lim1 = 1.0 / jnp.sqrt(num_embed)
    lim2 = 1.0 / jnp.sqrt(hidden)
    w1 = jax.random.uniform(k1, (num_embed, hidden), jnp.float32, -lim1, lim1)
    b1 = jax.random.uniform(k2, (1, hidden), jnp.float32, -lim1, lim1)
    w2 = jax.random.uniform(k3, (hidden, num_embed), jnp.float32, -lim2, lim2)
    b2 = jax.random.uniform(k4, (1, num_embed), jnp.float32, -lim2, lim2)
    return w1, b1, w2, b2


if __name__ == "__main__":
    key = jax.random.PRNGKey(0)
    kx, kp = jax.random.split(key)

    B, T, E = 2, 8, 32          # batch, seq, num_embed
    x = jax.random.normal(kx, (B, T, E), jnp.float32)
    w1, b1, w2, b2 = init_params(kp, E)

    out = feed_forward(x, w1, b1, w2, b2)
    jax.block_until_ready(out)

    # Reference with matching bf16-matmul / f32-accumulate semantics
    # (eval-mode dropout == identity).
    x2 = x.reshape(-1, E).astype(jnp.bfloat16)
    h = jnp.dot(x2, w1.astype(jnp.bfloat16), preferred_element_type=jnp.float32)
    h = jnp.maximum(h + b1, 0.0)
    ref = jnp.dot(h.astype(jnp.bfloat16), w2.astype(jnp.bfloat16),
                  preferred_element_type=jnp.float32) + b2
    ref = ref.reshape(B, T, E).astype(x.dtype)

    assert out.shape == (B, T, E)
    assert jnp.allclose(out, ref, atol=2e-3, rtol=2e-3), (
        float(jnp.max(jnp.abs(out - ref))))

    print("KERNEL_OK")
</pallas_src>

<mosaic_0001>
module attributes {stable_mosaic.version = 11 : i64} {
  func.func @_ffn_kernel(%arg0: i32, %arg1: i32, %arg2: memref<16x32xbf16, #tpu.memory_space<vmem>>, %arg3: memref<32x128xbf16, #tpu.memory_space<vmem>>, %arg4: memref<1x128xf32, #tpu.memory_space<vmem>>, %arg5: memref<128x32xbf16, #tpu.memory_space<vmem>>, %arg6: memref<1x32xf32, #tpu.memory_space<vmem>>, %arg7: memref<16x32xf32, #tpu.memory_space<vmem>>, %arg8: memref<16x32xf32, #tpu.memory_space<vmem>>) attributes {dimension_semantics = [#tpu.dimension_semantics<parallel>, #tpu.dimension_semantics<arbitrary>], iteration_bounds = array<i64: 1, 1>, scalar_prefetch = 0 : i64, scratch_operands = 1 : i64, tpu.core_type = #tpu.core_type<tc>, window_params = [{transform_indices = @transform_0, window_bounds = array<i64: 16, 32>}, {transform_indices = @transform_1, window_bounds = array<i64: 32, 128>}, {transform_indices = @transform_2, window_bounds = array<i64: 1, 128>}, {transform_indices = @transform_3, window_bounds = array<i64: 128, 32>}, {pipeline_mode = #tpu.pipeline_mode<synchronous>, transform_indices = @transform_4, window_bounds = array<i64: 1, 32>}, {transform_indices = @transform_5, window_bounds = array<i64: 16, 32>}]} {
    %c0 = arith.constant 0 : index
    %c0_0 = arith.constant 0 : index
    %0 = vector.load %arg2[%c0, %c0_0] : memref<16x32xbf16, #tpu.memory_space<vmem>>, vector<16x32xbf16>
    %c0_1 = arith.constant 0 : index
    %c0_2 = arith.constant 0 : index
    %1 = vector.load %arg3[%c0_1, %c0_2] : memref<32x128xbf16, #tpu.memory_space<vmem>>, vector<32x128xbf16>
    %cst = arith.constant dense<0.000000e+00> : vector<16x128xf32>
    %2 = tpu.matmul %0, %1, %cst {dimension_numbers = #tpu.dot_dimension_numbers<[1], [0], [0], [1], [0, 0, 1, 1], [], []>} : vector<16x32xbf16>, vector<32x128xbf16>, vector<16x128xf32> -> vector<16x128xf32>
    %c0_3 = arith.constant 0 : index
    %c0_4 = arith.constant 0 : index
    %3 = vector.load %arg4[%c0_3, %c0_4] : memref<1x128xf32, #tpu.memory_space<vmem>>, vector<1x128xf32>
    %4 = vector.broadcast %3 : vector<1x128xf32> to vector<16x128xf32>
    %5 = arith.addf %2, %4 : vector<16x128xf32>
    %cst_5 = arith.constant 0.000000e+00 : f32
    %6 = vector.broadcast %cst_5 : f32 to vector<16x128xf32>
    %7 = arith.maximumf %5, %6 : vector<16x128xf32>
    %8 = arith.truncf %7 : vector<16x128xf32> to vector<16x128xbf16>
    %c0_6 = arith.constant 0 : index
    %c0_7 = arith.constant 0 : index
    %9 = vector.load %arg5[%c0_6, %c0_7] : memref<128x32xbf16, #tpu.memory_space<vmem>>, vector<128x32xbf16>
    %cst_8 = arith.constant dense<0.000000e+00> : vector<16x32xf32>
    %10 = tpu.matmul %8, %9, %cst_8 {dimension_numbers = #tpu.dot_dimension_numbers<[1], [0], [0], [1], [0, 0, 1, 1], [], []>} : vector<16x128xbf16>, vector<128x32xbf16>, vector<16x32xf32> -> vector<16x32xf32>
    %c0_i32 = arith.constant 0 : i32
    %11 = arith.cmpi eq, %arg1, %c0_i32 : i32
    %12 = arith.extui %11 : i1 to i32
    %c0_i32_9 = arith.constant 0 : i32
    %13 = arith.cmpi ne, %12, %c0_i32_9 : i32
    scf.if %13 {
      %c0_14 = arith.constant 0 : index
      %c0_15 = arith.constant 0 : index
      %20 = vector.load %arg8[%c0_14, %c0_15] : memref<16x32xf32, #tpu.memory_space<vmem>>, vector<16x32xf32>
      tpu.vector_store %arg8[%c0_14, %c0_15], %10 {strides = array<i32>} : memref<16x32xf32, #tpu.memory_space<vmem>>, vector<16x32xf32>,
    } else {
    }
    %c0_i32_10 = arith.constant 0 : i32
    %14 = arith.cmpi sgt, %arg1, %c0_i32_10 : i32
    %15 = arith.extui %14 : i1 to i32
    %c0_i32_11 = arith.constant 0 : i32
    %16 = arith.cmpi ne, %15, %c0_i32_11 : i32
    scf.if %16 {
      %c0_14 = arith.constant 0 : index
      %c0_15 = arith.constant 0 : index
      %20 = vector.load %arg8[%c0_14, %c0_15] : memref<16x32xf32, #tpu.memory_space<vmem>>, vector<16x32xf32>
      %21 = arith.addf %20, %10 : vector<16x32xf32>
      %c0_16 = arith.constant 0 : index
      %c0_17 = arith.constant 0 : index
      %22 = vector.load %arg8[%c0_16, %c0_17] : memref<16x32xf32, #tpu.memory_space<vmem>>, vector<16x32xf32>
      tpu.vector_store %arg8[%c0_16, %c0_17], %21 {strides = array<i32>} : memref<16x32xf32, #tpu.memory_space<vmem>>, vector<16x32xf32>,
    } else {
    }
    %c0_i32_12 = arith.constant 0 : i32
    %17 = arith.cmpi eq, %arg1, %c0_i32_12 : i32
    %18 = arith.extui %17 : i1 to i32
    %c0_i32_13 = arith.constant 0 : i32
    %19 = arith.cmpi ne, %18, %c0_i32_13 : i32
    scf.if %19 {
      %c0_14 = arith.constant 0 : index
      %c0_15 = arith.constant 0 : index
      %20 = vector.load %arg8[%c0_14, %c0_15] : memref<16x32xf32, #tpu.memory_space<vmem>>, vector<16x32xf32>
      %c0_16 = arith.constant 0 : index
      %c0_17 = arith.constant 0 : index
      %21 = vector.load %arg6[%c0_16, %c0_17] : memref<1x32xf32, #tpu.memory_space<vmem>>, vector<1x32xf32>
      %22 = vector.broadcast %21 : vector<1x32xf32> to vector<16x32xf32>
      %23 = arith.addf %20, %22 : vector<16x32xf32>
      %c0_18 = arith.constant 0 : index
      %c0_19 = arith.constant 0 : index
      %24 = vector.load %arg7[%c0_18, %c0_19] : memref<16x32xf32, #tpu.memory_space<vmem>>, vector<16x32xf32>
      tpu.vector_store %arg7[%c0_18, %c0_19], %23 {strides = array<i32>} : memref<16x32xf32, #tpu.memory_space<vmem>>, vector<16x32xf32>,
    } else {
    }
    return
  }
  func.func @transform_0(%arg0: i32, %arg1: i32) -> (i32, i32) {
    %c0_i32 = arith.constant 0 : i32
    %c0_i32_0 = arith.constant 0 : i32
    return %arg0, %c0_i32 : i32, i32
  }
  func.func @transform_1(%arg0: i32, %arg1: i32) -> (i32, i32) {
    %c0_i32 = arith.constant 0 : i32
    %c0_i32_0 = arith.constant 0 : i32
    return %c0_i32, %arg1 : i32, i32
  }
  func.func @transform_2(%arg0: i32, %arg1: i32) -> (i32, i32) {
    %c0_i32 = arith.constant 0 : i32
    %c0_i32_0 = arith.constant 0 : i32
    return %c0_i32, %arg1 : i32, i32
  }
  func.func @transform_3(%arg0: i32, %arg1: i32) -> (i32, i32) {
    %c0_i32 = arith.constant 0 : i32
    %c0_i32_0 = arith.constant 0 : i32
    return %arg1, %c0_i32 : i32, i32
  }
  func.func @transform_4(%arg0: i32, %arg1: i32) -> (i32, i32) {
    %c0_i32 = arith.constant 0 : i32
    %c0_i32_0 = arith.constant 0 : i32
    %c0_i32_1 = arith.constant 0 : i32
    return %c0_i32, %c0_i32_0 : i32, i32
  }
  func.func @transform_5(%arg0: i32, %arg1: i32) -> (i32, i32) {
    %c0_i32 = arith.constant 0 : i32
    %c0_i32_0 = arith.constant 0 : i32
    return %arg0, %c0_i32 : i32, i32
  }
}

</mosaic_0001>

<bundles_post_ra>
// kernel: feed_forward.1
= control target key start
LH: loop header
LB: loop body
LE: loop exit
PB: predicated region body
PF: predicated region fallthrough
CT: control target
= control target key end

     0   :  { %s362_s0 = inlined_call_operand.vmem [shape: bf16[16,32], index: 0, kind: input, shape index: {}]   ;;  %s363_s1 = inlined_call_operand.vmem [shape: bf16[32,128], index: 1, kind: input, shape index: {}]   ;;  %s364_s2 = inlined_call_operand.vmem [shape: f32[1,128], index: 2, kind: input, shape index: {}]   ;;  %s365_s3 = inlined_call_operand.vmem [shape: bf16[128,32], index: 3, kind: input, shape index: {}]   ;;  %s366_s4 = inlined_call_operand.vmem [shape: f32[1,32], index: 4, kind: input, shape index: {}]   ;;  %s367_s5 = inlined_call_operand.hbm [shape: f32[16,32], index: 5, kind: output, shape index: {}]  }
   0x1   :  { %v242_v0 = vld [vmem:[%s363_s1 + $0x8] sm:$0xff]  ;;  %v250_v1 = vld [vmem:[%s365_s3 + $0x38] sm:$0xff]  ;;  %v241_v2 = vld [vmem:[%s363_s1] sm:$0xff] }
   0x2   :  { %59 = vmatpush.bf16.msra.mxu0 %v242_v0  ;;  %134 = vmatpush.bf16.msra.mxu1 %v250_v1  ;;  %v249_v3 = vld [vmem:[%s365_s3 + $0x30] sm:$0xff] }
   0x3   :  { %10 = vsyncpa [#allocation4], 0  ;;  %v240_v4 = vld [vmem:[%s362_s0] sm:$0xff]  ;;  %vm49_vm0 = vcmask 261120   ;;  %v248_v5 = vld [vmem:[%s365_s3 + $0x28] sm:$0xff]  ;;  %s183_s19 = sshll.u32 %s367_s5, 4  ;;  %s184_s19 = int_to_ptr.hbm [resolvable:$true] %s183_s19 }
   0x4   :  { %v247_v6 = vld [vmem:[%s365_s3 + $0x20] sm:$0xff]  ;;  %v246_v7 = vld [vmem:[%s365_s3 + $0x18] sm:$0xff]  ;;  %v245_v8 = vld [vmem:[%s365_s3 + $0x10] sm:$0xff]  ;;  %s284_s20 = smov 8  }
   0x5   :  { %v244_v9 = vld [vmem:[%s365_s3 + $0x8] sm:$0xff]  ;;  %v243_v10 = vld [vmem:[%s365_s3] sm:$0xff] }
   0x6   :  { %60 = vmatpush.bf16.msra.mxu0 %v241_v2  ;;  %135 = vmatpush.bf16.msra.mxu1 %v249_v3  ;;  %v254_v12 = vld [vmem:[%s364_s2] ss:$0 sm:$0xff]  ;;  %s282_s2 = smov [#allocation3]  }
   0x7   :  { %v255_v20 = vld [vmem:[%s366_s4] ss:$0 sm:$0xff]  ;;  %s181_s3 = sshll.u32 %s282_s2, 4  ;;  %s283_s4 = smov 128   ;;  %s182_s3 = int_to_ptr.vmem [resolvable:$true] %s181_s3 }
   0x9   :  { %207 = vmatmul.msk.bf16.vlgmr.msra.gmra.mxu0 %vm49_vm0, %v240_v4 }
   0xa   :  { %136 = vmatpush.bf16.msra.mxu1 %v248_v5 }
   0xe   :  { %137 = vmatpush.bf16.msra.mxu1 %v247_v6 }
  0x12   :  { %138 = vmatpush.bf16.msra.mxu1 %v246_v7 }
  0x16   :  { %139 = vmatpush.bf16.msra.mxu1 %v245_v8 }
  0x1a   :  { %140 = vmatpush.bf16.msra.mxu1 %v244_v9 }
  0x1e   :  { %141 = vmatpush.bf16.msra.mxu1 %v243_v10 }
  0x86   :  { %v62_v11 = vpop.f32.mrf.mxu0 }
  0x87   :  { %v63_v13 = vadd.f32 %v254_v12, %v62_v11 }
  0x89   :  { %v67_v16 = vmax.f32 %v63_v13, 0.0 }
  0x8e   :  { %v64_v14 = vpop.f32.mrf.mxu0 }
  0x8f   :  { %v65_v15 = vadd.f32 %v254_v12, %v64_v14 }
  0x91   :  { %v68_v17 = vmax.f32 %v65_v15, 0.0 }
  0x93   :  { %v69_v18 = vpack.c.bf16 %v68_v17, %v67_v16 }
  0x95   :  { %142 = vmatmul.bf16.vlgmr.msra.gmra.mxu1 %v69_v18 }
 0x112   :  { %v143_v19 = vpop.f32.mrf.mxu1 }
 0x113   :  { %152 = vst.msk [vmem:[#allocation2] sm:$0xff] %vm49_vm0, %v143_v19 }
 0x11a   :  { %v145_v21 = vpop.f32.mrf.mxu1  ;;  %v167_v22 = vld [vmem:[#allocation2] sm:$0xff] }
 0x11b   :  { %153 = vst.msk [vmem:[#allocation2 + $0x8] sm:$0xff] %vm49_vm0, %v145_v21  ;;  %v173_v23 = vadd.f32 %v255_v20, %v167_v22 }
 0x11d   :  { %175 = vst.msk [vmem:[#allocation3] sm:$0xff] %vm49_vm0, %v173_v23 }
 0x122   :  { %v168_v24 = vld [vmem:[#allocation2 + $0x8] sm:$0xff] }
 0x123   :  { %v174_v25 = vadd.f32 %v255_v20, %v168_v24 }
 0x125   :  { %176 = vst.msk [vmem:[#allocation3 + $0x8] sm:$0xff] %vm49_vm0, %v174_v25 }
 0x126   :  { %189 = dma.vmem_to_hbm [thread:$0]  %s182_s3, 256, %s184_s19, [#allocation4], %s283_s4, %s283_s4, %s284_s20  }
 0x127   :  { %280 = dma.done.wait [#allocation4], 256  }
 0x128   :  { %281 = vsyncadd [#allocation4], 4294967040 }
 0x129   :  { %194 = vsyncpa [#allocation4], 1 }

</bundles_post_ra>
